<compile_context>
chip_gen: v7x
topology: tpu7x:2x2x1
jax: 0.10.0
libtpu: 0.0.40
codegen_flags: <defaults>
</compile_context>

<pallas_src>
import jax
import jax.numpy as jnp
from jax.experimental import pallas as pl
from jax.experimental.pallas import tpu as pltpu


def _round_up(n, m):
    return ((n + m - 1) // m) * m


def simple_nn_kernel(x_ref, w1_ref, b1_ref, w2_ref, b2_ref, o_ref):
    # fc1 + ReLU -- MXU matmul with f32 accumulation (works for f32 or bf16 x/w1).
    h = jnp.dot(x_ref[...], w1_ref[...], preferred_element_type=jnp.float32)
    h = jnp.maximum(h + b1_ref[...], 0.0)                      # (TB, 8) f32

    # fc2 + Sigmoid -- off the MXU: VPU multiply + lane reduction against the
    # (1, 8) w2 row, then EUP sigmoid.  Frees the MXU and avoids a second
    # push/pop that would serialize behind fc1.
    z = jnp.sum(h * w2_ref[...], axis=1, keepdims=True) + b2_ref[...]
    o_ref[...] = jax.nn.sigmoid(z)
    # NOTE: output last-dim of 1 means masked vst stores; output bytes are only
    # 1/16 of input bytes here so this is second-order.  If stores ever bind,
    # emit a lane-dense (TB//128, 128) slab instead.


def simple_nn_forward(x, w1, b1, w2, b2, *, tb=8192, activations_bf16=False):
    """x: (B, D) f32 -> (B, 1) f32, matching SimpleNN.forward.

    w1: (D, 8), b1: (1, 8) or (8,), w2: (8, 1) or (1, 8), b2: (1, 1) or (1,).
    """
    B, D = x.shape
    H = w1.shape[1]                                   # 8

    # Keep small params in f32; present w2 as a (1, H) row for the VPU reduction.
    w2_row = jnp.asarray(w2, jnp.float32).reshape(1, H)
    b1_row = jnp.asarray(b1, jnp.float32).reshape(1, H)
    b2_row = jnp.asarray(b2, jnp.float32).reshape(1, 1)

    if activations_bf16:
        # Halves HBM traffic of the dominant stream; slight numerics deviation.
        x = x.astype(jnp.bfloat16)
        w1 = w1.astype(jnp.bfloat16)
    else:
        w1 = jnp.asarray(w1, jnp.float32)

    # Batch tiling: TB multiple of 8 (sublane constraint), pad B up to a multiple
    # of TB so every grid step sees a full block; pad rows are sliced off below.
    TB = min(tb, _round_up(B, 8))
    Bp = _round_up(B, TB)
    if Bp != B:
        x = jnp.pad(x, ((0, Bp - B), (0, 0)))

    grid = (Bp // TB,)

    out = pl.pallas_call(
        simple_nn_kernel,
        out_shape=jax.ShapeDtypeStruct((Bp, 1), jnp.float32),
        grid_spec=pl.GridSpec(
            grid=grid,
            in_specs=[
                pl.BlockSpec((TB, D), lambda i: (i, 0)),   # x: streamed batch tiles
                pl.BlockSpec((D, H), lambda i: (0, 0)),    # w1: VMEM-resident
                pl.BlockSpec((1, H), lambda i: (0, 0)),    # b1: VMEM-resident
                pl.BlockSpec((1, H), lambda i: (0, 0)),    # w2 row: VMEM-resident
                pl.BlockSpec((1, 1), lambda i: (0, 0)),    # b2: VMEM-resident
            ],
            out_specs=pl.BlockSpec((TB, 1), lambda i: (i, 0)),
        ),
        compiler_params=pltpu.CompilerParams(
            # Batch tiles are independent -> shard across both TCs on v7x.
            dimension_semantics=("parallel",),
        ),
    )(x, w1, b1_row, w2_row, b2_row)

    return out[:B] if Bp != B else out


def init_params(key, input_size, hidden=8, out=1):
    """Deterministic init mimicking nn.Linear's U(-1/sqrt(fan_in), 1/sqrt(fan_in))."""
    k1, k2, k3, k4 = jax.random.split(key, 4)
    bound1 = 1.0 / jnp.sqrt(input_size)
    bound2 = 1.0 / jnp.sqrt(hidden)
    w1 = jax.random.uniform(k1, (input_size, hidden), jnp.float32, -bound1, bound1)
    b1 = jax.random.uniform(k2, (1, hidden), jnp.float32, -bound1, bound1)
    w2 = jax.random.uniform(k3, (hidden, out), jnp.float32, -bound2, bound2)
    b2 = jax.random.uniform(k4, (1, out), jnp.float32, -bound2, bound2)
    return w1, b1, w2, b2


def _reference(x, w1, b1, w2, b2):
    return jax.nn.sigmoid(jnp.maximum(x @ w1 + b1, 0.0) @ w2 + b2)


if __name__ == "__main__":
    key = jax.random.PRNGKey(0)
    kx, kp, kx2 = jax.random.split(key, 3)

    input_size = 16   # stands in for X.shape[1]
    w1, b1, w2, b2 = init_params(kp, input_size)

    # Test 1: toy batch (single grid point, TB == padded batch).
    batch = 8
    x = jax.random.normal(kx, (batch, input_size), dtype=jnp.float32)
    out = jax.block_until_ready(simple_nn_forward(x, w1, b1, w2, b2))
    ref = _reference(x, w1, b1, w2, b2)
    assert out.shape == (batch, 1)
    assert jnp.allclose(out, ref, atol=1e-5, rtol=1e-5)

    # Test 2: non-multiple batch with a small tile to exercise the tiled,
    # pipelined path and the ragged-tail padding (grid=(4,), TB=32, pad 100->128).
    batch2 = 100
    x2 = jax.random.normal(kx2, (batch2, input_size), dtype=jnp.float32)
    out2 = jax.block_until_ready(simple_nn_forward(x2, w1, b1, w2, b2, tb=32))
    ref2 = _reference(x2, w1, b1, w2, b2)
    assert out2.shape == (batch2, 1)
    assert jnp.allclose(out2, ref2, atol=1e-5, rtol=1e-5)

    print("KERNEL_OK")
</pallas_src>

<mosaic_0001>
module attributes {stable_mosaic.version = 11 : i64} {
  func.func @simple_nn_kernel(%arg0: i32, %arg1: memref<8x16xf32, #tpu.memory_space<vmem>>, %arg2: memref<16x8xf32, #tpu.memory_space<vmem>>, %arg3: memref<1x8xf32, #tpu.memory_space<vmem>>, %arg4: memref<1x8xf32, #tpu.memory_space<vmem>>, %arg5: memref<1x1xf32, #tpu.memory_space<vmem>>, %arg6: memref<8x1xf32, #tpu.memory_space<vmem>>) attributes {dimension_semantics = [#tpu.dimension_semantics<parallel>], iteration_bounds = array<i64: 1>, scalar_prefetch = 0 : i64, scratch_operands = 0 : i64, tpu.core_type = #tpu.core_type<tc>, window_params = [{transform_indices = @transform_0, window_bounds = array<i64: 8, 16>}, {pipeline_mode = #tpu.pipeline_mode<synchronous>, transform_indices = @transform_1, window_bounds = array<i64: 16, 8>}, {pipeline_mode = #tpu.pipeline_mode<synchronous>, transform_indices = @transform_2, window_bounds = array<i64: 1, 8>}, {pipeline_mode = #tpu.pipeline_mode<synchronous>, transform_indices = @transform_3, window_bounds = array<i64: 1, 8>}, {pipeline_mode = #tpu.pipeline_mode<synchronous>, transform_indices = @transform_4, window_bounds = array<i64: 1, 1>}, {transform_indices = @transform_5, window_bounds = array<i64: 8, 1>}]} {
    %c0 = arith.constant 0 : index
    %c0_0 = arith.constant 0 : index
    %0 = vector.load %arg1[%c0, %c0_0] : memref<8x16xf32, #tpu.memory_space<vmem>>, vector<8x16xf32>
    %c0_1 = arith.constant 0 : index
    %c0_2 = arith.constant 0 : index
    %1 = vector.load %arg2[%c0_1, %c0_2] : memref<16x8xf32, #tpu.memory_space<vmem>>, vector<16x8xf32>
    %cst = arith.constant dense<0.000000e+00> : vector<8x8xf32>
    %2 = tpu.matmul %0, %1, %cst {dimension_numbers = #tpu.dot_dimension_numbers<[1], [0], [0], [1], [0, 0, 1, 1], [], []>} : vector<8x16xf32>, vector<16x8xf32>, vector<8x8xf32> -> vector<8x8xf32>
    %c0_3 = arith.constant 0 : index
    %c0_4 = arith.constant 0 : index
    %3 = vector.load %arg3[%c0_3, %c0_4] : memref<1x8xf32, #tpu.memory_space<vmem>>, vector<1x8xf32>
    %4 = vector.broadcast %3 : vector<1x8xf32> to vector<8x8xf32>
    %5 = arith.addf %2, %4 : vector<8x8xf32>
    %cst_5 = arith.constant 0.000000e+00 : f32
    %6 = vector.broadcast %cst_5 : f32 to vector<8x8xf32>
    %7 = arith.maximumf %5, %6 : vector<8x8xf32>
    %c0_6 = arith.constant 0 : index
    %c0_7 = arith.constant 0 : index
    %8 = vector.load %arg4[%c0_6, %c0_7] : memref<1x8xf32, #tpu.memory_space<vmem>>, vector<1x8xf32>
    %9 = vector.broadcast %8 : vector<1x8xf32> to vector<8x8xf32>
    %10 = arith.mulf %7, %9 : vector<8x8xf32>
    %cst_8 = arith.constant dense<0.000000e+00> : vector<8xf32>
    %11 = vector.multi_reduction <add>, %10, %cst_8 [1] : vector<8x8xf32> to vector<8xf32>
    %12 = vector.shape_cast %11 : vector<8xf32> to vector<8x1xf32>
    %c0_9 = arith.constant 0 : index
    %c0_10 = arith.constant 0 : index
    %13 = vector.load %arg5[%c0_9, %c0_10] : memref<1x1xf32, #tpu.memory_space<vmem>>, vector<1x1xf32>
    %14 = vector.broadcast %13 : vector<1x1xf32> to vector<8x1xf32>
    %15 = arith.addf %12, %14 : vector<8x1xf32>
    %16 = arith.negf %15 : vector<8x1xf32>
    %17 = math.exp %16 : vector<8x1xf32>
    %cst_11 = arith.constant 1.000000e+00 : f32
    %18 = vector.broadcast %cst_11 : f32 to vector<8x1xf32>
    %19 = arith.addf %18, %17 : vector<8x1xf32>
    %20 = arith.divf %18, %19 : vector<8x1xf32>
    %c0_12 = arith.constant 0 : index
    %c0_13 = arith.constant 0 : index
    %21 = vector.load %arg6[%c0_12, %c0_13] : memref<8x1xf32, #tpu.memory_space<vmem>>, vector<8x1xf32>
    tpu.vector_store %arg6[%c0_12, %c0_13], %20 {strides = array<i32>} : memref<8x1xf32, #tpu.memory_space<vmem>>, vector<8x1xf32>,
    return
  }
  func.func @transform_0(%arg0: i32) -> (i32, i32) {
    %c0_i32 = arith.constant 0 : i32
    %c0_i32_0 = arith.constant 0 : i32
    return %arg0, %c0_i32 : i32, i32
  }
  func.func @transform_1(%arg0: i32) -> (i32, i32) {
    %c0_i32 = arith.constant 0 : i32
    %c0_i32_0 = arith.constant 0 : i32
    %c0_i32_1 = arith.constant 0 : i32
    return %c0_i32, %c0_i32_0 : i32, i32
  }
  func.func @transform_2(%arg0: i32) -> (i32, i32) {
    %c0_i32 = arith.constant 0 : i32
    %c0_i32_0 = arith.constant 0 : i32
    %c0_i32_1 = arith.constant 0 : i32
    return %c0_i32, %c0_i32_0 : i32, i32
  }
  func.func @transform_3(%arg0: i32) -> (i32, i32) {
    %c0_i32 = arith.constant 0 : i32
    %c0_i32_0 = arith.constant 0 : i32
    %c0_i32_1 = arith.constant 0 : i32
    return %c0_i32, %c0_i32_0 : i32, i32
  }
  func.func @transform_4(%arg0: i32) -> (i32, i32) {
    %c0_i32 = arith.constant 0 : i32
    %c0_i32_0 = arith.constant 0 : i32
    %c0_i32_1 = arith.constant 0 : i32
    return %c0_i32, %c0_i32_0 : i32, i32
  }
  func.func @transform_5(%arg0: i32) -> (i32, i32) {
    %c0_i32 = arith.constant 0 : i32
    %c0_i32_0 = arith.constant 0 : i32
    return %arg0, %c0_i32 : i32, i32
  }
}

</mosaic_0001>

<bundles_post_ra>
// kernel: tpu_custom_call.1
= control target key start
LH: loop header
LB: loop body
LE: loop exit
PB: predicated region body
PF: predicated region fallthrough
CT: control target
= control target key end

     0   :  { %v164_v0 = vmov 0.0|0.0   ;;  %vm165_vm0 = vmmov 0   ;;  %v166_v3 = vmov 0.0   ;;  %vm32_vm1 = vcmask 130048   ;;  %s218_s1 = inlined_call_operand.vmem [shape: f32[16,8], index: 1, kind: input, shape index: {}]   ;;  %s219_s0 = inlined_call_operand.vmem [shape: f32[8,16], index: 0, kind: input, shape index: {}]   ;;  %s220_s4 = inlined_call_operand.<no memory space> [shape: f32[1,1], index: 4, kind: input, shape index: {}]   ;;  %s221_s2 = inlined_call_operand.vmem [shape: f32[1,8], index: 2, kind: input, shape index: {}]   ;;  %s222_s3 = inlined_call_operand.vmem [shape: f32[1,8], index: 3, kind: input, shape index: {}]   ;;  %s223_s5 = inlined_call_operand.vmem [shape: f32[8,1], index: 5, kind: output, shape index: {}]  }
   0x1   :  { %154 = vmatprep.subr.bf16.mxu0 %v164_v0  ;;  %v23_v1 = vld [vmem:[%s218_s1] sm:$0xff]  ;;  %v24_v2 = vld [vmem:[%s218_s1 + $0x8] sm:$0xff]  ;;  %151 = vmatprep.mubr.msk.f32.mxu0 %vm165_vm0, %v166_v3  ;;  %v10_v6 = vstv %s220_s4  ;;  %vm115_vm2 = vcmask 64512   ;;  %vm133_vm3 = vcmask 7168  }
   0x2   :  { %v155_v4 = vpack.c.bf16 %v24_v2, %v23_v1  ;;  %v22_v5 = vld [vmem:[%s219_s0] sm:$0xff]  ;;  %11 = vst [vmem:[#allocation2] sm:$0x1] %v10_v6 }
   0x3   :  { %v139_v7 = vld [vmem:[%s221_s2] ss:$0 sm:$0xff] }
   0x4   :  { %156 = vmatpush3.bf16.msra.mxu0 %v155_v4  ;;  %v141_v11 = vld [vmem:[%s222_s3] ss:$0 sm:$0xff] }
   0x7   :  { %152 = vmatmul.mubr.msk.f32.vlgmr.msra.gmra.mrb[0].mxu0 %vm32_vm1, %v22_v5 }
   0x9   :  { %v142_v15 = vld [vmem:[#allocation2] ss:$0 sm:$0xff] }
  0xda   :  { %v102_v8 = vpop.f32.mrb[0].mxu0 }
  0xdb   :  { %v103_v9 = vadd.f32 %v139_v7, %v102_v8  ;;  %v153_v10 = vpop.f32.mrb[1].mxu0 }
  0xdd   :  { %v106_v12 = vmax.f32 %v103_v9, 0.0 }
  0xdf   :  { %v114_v13 = vmul.f32 %v141_v11, %v106_v12 }
  0xe1   :  { %v116_v14 = vsel %vm115_vm2, %v114_v13, 0.0 }
  0xe2   :  { %117 = vadd.xlane.f32.xlu0 %v116_v14 }
 0x16f   :  { %v118_v16 = vpop.xlane.xlu0 %117 }
 0x170   :  { %v126_v17 = vadd.f32 %v142_v15, %v118_v16 }
 0x172   :  { %v143_v18 = vmul.f32 -1.442695, %v126_v17 }
 0x174   :  { %160 = vpow2.f32 %v143_v18 }
 0x17e   :  { %v161_v19 = vpop.eup %160 }
 0x17f   :  { %v130_v20 = vadd.f32 1.0, %v161_v19 }
 0x181   :  { %162 = vrcp.f32 %v130_v20 }
 0x18b   :  { %v163_v21 = vpop.eup %162 }
 0x18c   :  { %134 = vst.msk [vmem:[%s223_s5] sm:$0xff] %vm133_vm3, %v163_v21 }

</bundles_post_ra>
